<compile_context>
chip_gen: v7x
topology: tpu7x:2x2x1
jax: 0.10.0
libtpu: 0.0.40
codegen_flags: <defaults>
</compile_context>

<pallas_src>
import jax
import jax.numpy as jnp
from jax import lax
from jax.experimental import pallas as pl
from jax.experimental.pallas import tpu as pltpu

LEAKY_SLOPE = 0.01   # torch.nn.LeakyReLU default negative_slope
LANES = 128          # TPU lane width


def _round_up(n, m):
    return ((n + m - 1) // m) * m


def _leaky_relu(x):
    # slope < 1  =>  max(x, slope*x) == leaky_relu(x); 2 VPU ops vs 3 for where().
    return jnp.maximum(x, LEAKY_SLOPE * x)


def _vmem_estimate_bytes(tile_b, k_pad, h_dim):
    """Rough VMEM working-set estimate for the kernel (generous)."""
    bf16, f32 = 2, 4
    x_tiles = 2 * tile_b * k_pad * bf16                              # double-buffered input
    weights = (k_pad * h_dim + 2 * h_dim * h_dim + h_dim) * bf16     # single-buffered
    biases = 3 * h_dim * f32
    out_tiles = 2 * tile_b * f32                                     # (1, tile_b) f32, double-buffered
    interm = 4 * tile_b * h_dim * f32                                # live f32 activations
    return x_tiles + weights + biases + out_tiles + interm


def discriminator_kernel(x_ref,
                         w1_ref, b1_ref,
                         w2_ref, b2_ref,
                         w3_ref, b3_ref,
                         w4_ref, b4_ref,
                         o_ref):
    # x tile: (tile_b, K_pad) bf16; weights bf16; biases f32; accumulate f32.
    x = x_ref[...]
    h = jnp.dot(x, w1_ref[...], preferred_element_type=jnp.float32) + b1_ref[...]
    h = _leaky_relu(h)
    h = jnp.dot(h.astype(jnp.bfloat16), w2_ref[...],
                preferred_element_type=jnp.float32) + b2_ref[...]
    h = _leaky_relu(h)
    h = jnp.dot(h.astype(jnp.bfloat16), w3_ref[...],
                preferred_element_type=jnp.float32) + b3_ref[...]
    h = _leaky_relu(h)

    # Final layer: contract the h_dim axis of the (1, h_dim) weight row against
    # the h_dim axis of h -> result is already a lane-dense (1, tile_b) row.
    logits = lax.dot_general(
        w4_ref[...], h.astype(jnp.bfloat16),
        dimension_numbers=(((1,), (1,)), ((), ())),
        preferred_element_type=jnp.float32)               # (1, tile_b)

    o_ref[...] = (logits + b4_ref[0]).astype(o_ref.dtype)


def discriminator_forward(x, params, *, tile_b=None):
    """x: (B, X_dim) f32. params: W1..W4 (in,out layout), b1..b4. Returns (B, 1) f32."""
    B, x_dim = x.shape
    h_dim = params["W1"].shape[1]
    assert h_dim % LANES == 0, "h_dim must be a multiple of 128"

    if tile_b is None:
        # MXU-friendly: at least 256 rows per step (fills the 256-tall MXU on
        # v6e/v7x), up to 512; never pad a tiny batch past the next 256.
        tile_b = int(min(512, max(256, _round_up(B, 256))))
    assert tile_b % LANES == 0, "tile_b must be a multiple of 128"

    k_pad = _round_up(x_dim, LANES)          # pad layer-1 contraction dim
    b_pad = _round_up(max(B, 1), tile_b)     # pad batch to the tile size

    # bf16 operands (MXU-native); zero padding does not change the math.
    # Skip the extra padded copy entirely when shapes are already aligned.
    x_b = x.astype(jnp.bfloat16)
    if (b_pad, k_pad) != (B, x_dim):
        x_b = jnp.pad(x_b, ((0, b_pad - B), (0, k_pad - x_dim)))

    w1 = params["W1"].astype(jnp.bfloat16)
    if k_pad != x_dim:
        w1 = jnp.pad(w1, ((0, k_pad - x_dim), (0, 0)))
    w2 = params["W2"].astype(jnp.bfloat16)
    w3 = params["W3"].astype(jnp.bfloat16)
    w4 = params["W4"].astype(jnp.bfloat16).reshape(1, h_dim)   # (h_dim,1) -> row
    b1 = params["b1"].astype(jnp.float32)
    b2 = params["b2"].astype(jnp.float32)
    b3 = params["b3"].astype(jnp.float32)
    b4 = params["b4"].astype(jnp.float32).reshape(1)           # 1-D scalar in SMEM

    # Grid-invariant operands: fetched once, so single-buffer them.
    def const(shape):
        return pl.BlockSpec(shape, lambda i: (0, 0),
                            pipeline_mode=pl.Buffered(1))

    vmem_limit = int(1.25 * _vmem_estimate_bytes(tile_b, k_pad, h_dim)) + (2 << 20)
    vmem_limit = max(32 << 20, min(vmem_limit, 60 << 20))

    out = pl.pallas_call(
        discriminator_kernel,
        out_shape=jax.ShapeDtypeStruct((1, b_pad), jnp.float32),
        grid_spec=pltpu.PrefetchScalarGridSpec(
            num_scalar_prefetch=0,
            grid=(b_pad // tile_b,),
            in_specs=[
                pl.BlockSpec((tile_b, k_pad), lambda i: (i, 0)),    # x tile
                const((k_pad, h_dim)), const((1, h_dim)),           # layer 1
                const((h_dim, h_dim)), const((1, h_dim)),           # layer 2
                const((h_dim, h_dim)), const((1, h_dim)),           # layer 3
                const((1, h_dim)),                                  # layer 4 row
                pl.BlockSpec(memory_space=pltpu.MemorySpace.SMEM),  # b4 scalar
            ],
            # Lane-dense output: each grid step writes a full (1, tile_b) row
            # slab (unmasked full-width stores).
            out_specs=pl.BlockSpec((1, tile_b), lambda i: (0, i)),
        ),
        compiler_params=pltpu.CompilerParams(
            dimension_semantics=("parallel",),
            vmem_limit_bytes=vmem_limit),
    )(x_b, w1, b1, w2, b2, w3, b3, w4, b4)

    return out[0, :B].reshape(B, 1)


def init_params(key, x_dim, h_dim):
    """kaiming_normal_ on weights, PyTorch-default uniform bias init."""
    ks = jax.random.split(key, 8)

    def kaiming(k, fan_in, fan_out):
        std = jnp.sqrt(2.0 / fan_in)
        return jax.random.normal(k, (fan_in, fan_out), jnp.float32) * std

    def bias(k, fan_in, fan_out):
        bound = 1.0 / jnp.sqrt(fan_in)
        return jax.random.uniform(k, (1, fan_out), jnp.float32, -bound, bound)

    return {
        "W1": kaiming(ks[0], x_dim, h_dim), "b1": bias(ks[1], x_dim, h_dim),
        "W2": kaiming(ks[2], h_dim, h_dim), "b2": bias(ks[3], h_dim, h_dim),
        "W3": kaiming(ks[4], h_dim, h_dim), "b3": bias(ks[5], h_dim, h_dim),
        "W4": kaiming(ks[6], h_dim, 1),     "b4": bias(ks[7], h_dim, 1),
    }


def reference_forward(x, p):
    """f32 reference that applies the same bf16 operand rounding as the kernel."""
    def lin(h, w, b):
        hb = h.astype(jnp.bfloat16).astype(jnp.float32)
        wb = w.astype(jnp.bfloat16).astype(jnp.float32)
        return jnp.dot(hb, wb) + b
    h = _leaky_relu(lin(x, p["W1"], p["b1"]))
    h = _leaky_relu(lin(h, p["W2"], p["b2"]))
    h = _leaky_relu(lin(h, p["W3"], p["b3"]))
    return lin(h, p["W4"], p["b4"])


if __name__ == "__main__":
    key = jax.random.PRNGKey(0)
    k_x, k_p = jax.random.split(key)

    # Small test sizes (production module uses h_dim=512, X_dim=img.shape[-1]).
    X_DIM, H_DIM, B = 64, 128, 200   # B / X_dim not lane multiples -> exercises padding
    x = jax.random.normal(k_x, (B, X_DIM), jnp.float32)
    params = init_params(k_p, X_DIM, H_DIM)

    out = jax.block_until_ready(discriminator_forward(x, params))
    ref = reference_forward(x, params)

    assert out.shape == (B, 1)
    max_err = float(jnp.max(jnp.abs(out - ref)))
    assert jnp.allclose(out, ref, atol=1e-2, rtol=1e-2), max_err

    print("KERNEL_OK")
</pallas_src>

<mosaic_0001>
module attributes {stable_mosaic.version = 11 : i64} {
  func.func @discriminator_kernel(%arg0: i32, %arg1: memref<256x128xbf16, #tpu.memory_space<vmem>>, %arg2: memref<128x128xbf16, #tpu.memory_space<vmem>>, %arg3: memref<1x128xf32, #tpu.memory_space<vmem>>, %arg4: memref<128x128xbf16, #tpu.memory_space<vmem>>, %arg5: memref<1x128xf32, #tpu.memory_space<vmem>>, %arg6: memref<128x128xbf16, #tpu.memory_space<vmem>>, %arg7: memref<1x128xf32, #tpu.memory_space<vmem>>, %arg8: memref<1x128xbf16, #tpu.memory_space<vmem>>, %arg9: memref<1xf32, #tpu.memory_space<smem>>, %arg10: memref<1x256xf32, #tpu.memory_space<vmem>>) attributes {dimension_semantics = [#tpu.dimension_semantics<parallel>], iteration_bounds = array<i64: 1>, scalar_prefetch = 0 : i64, scratch_operands = 0 : i64, tpu.core_type = #tpu.core_type<tc>, window_params = [{transform_indices = @transform_0, window_bounds = array<i64: 256, 128>}, {pipeline_mode = #tpu.pipeline_mode<synchronous>, transform_indices = @transform_1, window_bounds = array<i64: 128, 128>}, {pipeline_mode = #tpu.pipeline_mode<synchronous>, transform_indices = @transform_2, window_bounds = array<i64: 1, 128>}, {pipeline_mode = #tpu.pipeline_mode<synchronous>, transform_indices = @transform_3, window_bounds = array<i64: 128, 128>}, {pipeline_mode = #tpu.pipeline_mode<synchronous>, transform_indices = @transform_4, window_bounds = array<i64: 1, 128>}, {pipeline_mode = #tpu.pipeline_mode<synchronous>, transform_indices = @transform_5, window_bounds = array<i64: 128, 128>}, {pipeline_mode = #tpu.pipeline_mode<synchronous>, transform_indices = @transform_6, window_bounds = array<i64: 1, 128>}, {pipeline_mode = #tpu.pipeline_mode<synchronous>, transform_indices = @transform_7, window_bounds = array<i64: 1, 128>}, {transform_indices = @transform_8, window_bounds = array<i64: 1>}, {transform_indices = @transform_9, window_bounds = array<i64: 1, 256>}]} {
    %c0 = arith.constant 0 : index
    %c0_0 = arith.constant 0 : index
    %0 = vector.load %arg1[%c0, %c0_0] : memref<256x128xbf16, #tpu.memory_space<vmem>>, vector<256x128xbf16>
    %c0_1 = arith.constant 0 : index
    %c0_2 = arith.constant 0 : index
    %1 = vector.load %arg2[%c0_1, %c0_2] : memref<128x128xbf16, #tpu.memory_space<vmem>>, vector<128x128xbf16>
    %cst = arith.constant dense<0.000000e+00> : vector<256x128xf32>
    %2 = tpu.matmul %0, %1, %cst {dimension_numbers = #tpu.dot_dimension_numbers<[1], [0], [0], [1], [0, 0, 1, 1], [], []>} : vector<256x128xbf16>, vector<128x128xbf16>, vector<256x128xf32> -> vector<256x128xf32>
    %c0_3 = arith.constant 0 : index
    %c0_4 = arith.constant 0 : index
    %3 = vector.load %arg3[%c0_3, %c0_4] : memref<1x128xf32, #tpu.memory_space<vmem>>, vector<1x128xf32>
    %4 = vector.broadcast %3 : vector<1x128xf32> to vector<256x128xf32>
    %5 = arith.addf %2, %4 : vector<256x128xf32>
    %cst_5 = arith.constant 0.00999999977 : f32
    %6 = vector.broadcast %cst_5 : f32 to vector<256x128xf32>
    %7 = arith.mulf %6, %5 : vector<256x128xf32>
    %8 = arith.maximumf %5, %7 : vector<256x128xf32>
    %9 = arith.truncf %8 : vector<256x128xf32> to vector<256x128xbf16>
    %c0_6 = arith.constant 0 : index
    %c0_7 = arith.constant 0 : index
    %10 = vector.load %arg4[%c0_6, %c0_7] : memref<128x128xbf16, #tpu.memory_space<vmem>>, vector<128x128xbf16>
    %cst_8 = arith.constant dense<0.000000e+00> : vector<256x128xf32>
    %11 = tpu.matmul %9, %10, %cst_8 {dimension_numbers = #tpu.dot_dimension_numbers<[1], [0], [0], [1], [0, 0, 1, 1], [], []>} : vector<256x128xbf16>, vector<128x128xbf16>, vector<256x128xf32> -> vector<256x128xf32>
    %c0_9 = arith.constant 0 : index
    %c0_10 = arith.constant 0 : index
    %12 = vector.load %arg5[%c0_9, %c0_10] : memref<1x128xf32, #tpu.memory_space<vmem>>, vector<1x128xf32>
    %13 = vector.broadcast %12 : vector<1x128xf32> to vector<256x128xf32>
    %14 = arith.addf %11, %13 : vector<256x128xf32>
    %cst_11 = arith.constant 0.00999999977 : f32
    %15 = vector.broadcast %cst_11 : f32 to vector<256x128xf32>
    %16 = arith.mulf %15, %14 : vector<256x128xf32>
    %17 = arith.maximumf %14, %16 : vector<256x128xf32>
    %18 = arith.truncf %17 : vector<256x128xf32> to vector<256x128xbf16>
    %c0_12 = arith.constant 0 : index
    %c0_13 = arith.constant 0 : index
    %19 = vector.load %arg6[%c0_12, %c0_13] : memref<128x128xbf16, #tpu.memory_space<vmem>>, vector<128x128xbf16>
    %cst_14 = arith.constant dense<0.000000e+00> : vector<256x128xf32>
    %20 = tpu.matmul %18, %19, %cst_14 {dimension_numbers = #tpu.dot_dimension_numbers<[1], [0], [0], [1], [0, 0, 1, 1], [], []>} : vector<256x128xbf16>, vector<128x128xbf16>, vector<256x128xf32> -> vector<256x128xf32>
    %c0_15 = arith.constant 0 : index
    %c0_16 = arith.constant 0 : index
    %21 = vector.load %arg7[%c0_15, %c0_16] : memref<1x128xf32, #tpu.memory_space<vmem>>, vector<1x128xf32>
    %22 = vector.broadcast %21 : vector<1x128xf32> to vector<256x128xf32>
    %23 = arith.addf %20, %22 : vector<256x128xf32>
    %cst_17 = arith.constant 0.00999999977 : f32
    %24 = vector.broadcast %cst_17 : f32 to vector<256x128xf32>
    %25 = arith.mulf %24, %23 : vector<256x128xf32>
    %26 = arith.maximumf %23, %25 : vector<256x128xf32>
    %c0_18 = arith.constant 0 : index
    %c0_19 = arith.constant 0 : index
    %27 = vector.load %arg8[%c0_18, %c0_19] : memref<1x128xbf16, #tpu.memory_space<vmem>>, vector<1x128xbf16>
    %28 = arith.truncf %26 : vector<256x128xf32> to vector<256x128xbf16>
    %cst_20 = arith.constant dense<0.000000e+00> : vector<1x256xf32>
    %29 = tpu.matmul %27, %28, %cst_20 {dimension_numbers = #tpu.dot_dimension_numbers<[1], [1], [0], [0], [0, 0, 1, 0], [], []>} : vector<1x128xbf16>, vector<256x128xbf16>, vector<1x256xf32> -> vector<1x256xf32>
    %c0_21 = arith.constant 0 : index
    %30 = memref.load %arg9[%c0_21] : memref<1xf32, #tpu.memory_space<smem>>
    %31 = vector.broadcast %30 : f32 to vector<1x256xf32>
    %32 = arith.addf %29, %31 : vector<1x256xf32>
    %c0_22 = arith.constant 0 : index
    %c0_23 = arith.constant 0 : index
    %33 = vector.load %arg10[%c0_22, %c0_23] : memref<1x256xf32, #tpu.memory_space<vmem>>, vector<1x256xf32>
    tpu.vector_store %arg10[%c0_22, %c0_23], %32 {strides = array<i32>} : memref<1x256xf32, #tpu.memory_space<vmem>>, vector<1x256xf32>,
    return
  }
  func.func @transform_0(%arg0: i32) -> (i32, i32) {
    %c0_i32 = arith.constant 0 : i32
    %c0_i32_0 = arith.constant 0 : i32
    return %arg0, %c0_i32 : i32, i32
  }
  func.func @transform_1(%arg0: i32) -> (i32, i32) {
    %c0_i32 = arith.constant 0 : i32
    %c0_i32_0 = arith.constant 0 : i32
    %c0_i32_1 = arith.constant 0 : i32
    return %c0_i32, %c0_i32_0 : i32, i32
  }
  func.func @transform_2(%arg0: i32) -> (i32, i32) {
    %c0_i32 = arith.constant 0 : i32
    %c0_i32_0 = arith.constant 0 : i32
    %c0_i32_1 = arith.constant 0 : i32
    return %c0_i32, %c0_i32_0 : i32, i32
  }
  func.func @transform_3(%arg0: i32) -> (i32, i32) {
    %c0_i32 = arith.constant 0 : i32
    %c0_i32_0 = arith.constant 0 : i32
    %c0_i32_1 = arith.constant 0 : i32
    return %c0_i32, %c0_i32_0 : i32, i32
  }
  func.func @transform_4(%arg0: i32) -> (i32, i32) {
    %c0_i32 = arith.constant 0 : i32
    %c0_i32_0 = arith.constant 0 : i32
    %c0_i32_1 = arith.constant 0 : i32
    return %c0_i32, %c0_i32_0 : i32, i32
  }
  func.func @transform_5(%arg0: i32) -> (i32, i32) {
    %c0_i32 = arith.constant 0 : i32
    %c0_i32_0 = arith.constant 0 : i32
    %c0_i32_1 = arith.constant 0 : i32
    return %c0_i32, %c0_i32_0 : i32, i32
  }
  func.func @transform_6(%arg0: i32) -> (i32, i32) {
    %c0_i32 = arith.constant 0 : i32
    %c0_i32_0 = arith.constant 0 : i32
    %c0_i32_1 = arith.constant 0 : i32
    return %c0_i32, %c0_i32_0 : i32, i32
  }
  func.func @transform_7(%arg0: i32) -> (i32, i32) {
    %c0_i32 = arith.constant 0 : i32
    %c0_i32_0 = arith.constant 0 : i32
    %c0_i32_1 = arith.constant 0 : i32
    return %c0_i32, %c0_i32_0 : i32, i32
  }
  func.func @transform_8(%arg0: i32) -> i32 {
    %c0_i32 = arith.constant 0 : i32
    %c0_i32_0 = arith.constant 0 : i32
    return %c0_i32 : i32
  }
  func.func @transform_9(%arg0: i32) -> (i32, i32) {
    %c0_i32 = arith.constant 0 : i32
    %c0_i32_0 = arith.constant 0 : i32
    return %c0_i32, %arg0 : i32, i32
  }
}

</mosaic_0001>

<bundles_post_ra>
// kernel: tpu_custom_call.1
= control target key start
LH: loop header
LB: loop body
LE: loop exit
PB: predicated region body
PF: predicated region fallthrough
CT: control target
= control target key end

     0   :  { %15 = vsyncpa [#allocation4], 0  ;;  %s1998_s0 = inlined_call_operand.hbm [shape: bf16[256,128], index: 0, kind: input, shape index: {}]   ;;  %s1999_s1 = inlined_call_operand.hbm [shape: bf16[128,128], index: 1, kind: input, shape index: {}]   ;;  %s2000_s2 = inlined_call_operand.vmem [shape: f32[1,128], index: 2, kind: input, shape index: {}]   ;;  %s2001_s3 = inlined_call_operand.hbm [shape: bf16[128,128], index: 3, kind: input, shape index: {}]   ;;  %s2002_s4 = inlined_call_operand.vmem [shape: f32[1,128], index: 4, kind: input, shape index: {}]   ;;  %s2003_s5 = inlined_call_operand.hbm [shape: bf16[128,128], index: 5, kind: input, shape index: {}]   ;;  %s2004_s6 = inlined_call_operand.vmem [shape: f32[1,128], index: 6, kind: input, shape index: {}]   ;;  %s2005_s7 = inlined_call_operand.vmem [shape: bf16[1,128], index: 7, kind: input, shape index: {}]   ;;  %s2006_s8 = inlined_call_operand.<no memory space> [shape: f32[1], index: 8, kind: input, shape index: {}]   ;;  %s2007_s9 = inlined_call_operand.hbm [shape: f32[1,256], index: 9, kind: output, shape index: {}]  }
   0x1   :  { %16 = vsyncpa [#allocation7], 0 }
   0x2   :  { %17 = vsyncpa [#allocation10], 0 }
   0x3   :  { %18 = vsyncpa [#allocation5], 0  ;;  %s1697_s30 = smov [#allocation6]   ;;  %s1698_s11 = smov [#allocation3]  }
   0x4   :  { %s36_s10 = sshll.u32 %s1697_s30, 4  ;;  %s24_s12 = sshll.u32 %s1698_s11, 4  ;;  %s37_s10 = int_to_ptr.vmem [resolvable:$true] %s36_s10  ;;  %s1755_s12 = int_to_ptr.vmem [resolvable:$true] %s24_s12 }
   0x5   :  { %s1579_s15 = scalar_lea.hbm %s1999_s1, 1024 }
   0x6   :  { %p1580_p0 = scmp.ne.s32.totalorder %s1999_s1, %s1579_s15  ;;  %p1583_p1 = scmp.lt.u32.totalorder %s1579_s15, %s1999_s1 }
   0x8   :  { %p1585_p2 = pnand %p1583_p1, %p1580_p0 }
   0xa   :  { %1588 = shalt.err (!%p1585_p2)
}
   0xb   :  { %s1589_s20 = scalar_lea.vmem %s37_s10, 1024  ;;  %p1594_p4 = scmp.lt.s32.totalorder %s37_s10, %s37_s10 }
   0xc   :  { %p1590_p3 = scmp.ne.s32.totalorder %s37_s10, %s1589_s20  ;;  %p1595_p5 = scmp.lt.s32.totalorder %s1589_s20, %s1589_s20 }
   0xe   :  { %p1596_p6 = por %p1595_p5, %p1594_p4 }
  0x10   :  { %p1597_p7 = pnand %p1596_p6, %p1590_p3 }
  0x12   :  { %1600 = shalt.err (!%p1597_p7)
}
  0x13   :  { %s1699_s21 = smov 64   ;;  %s1700_s22 = smov 4  }
  0x14   :  { %42 = dma.hbm_to_vmem [thread:$0]  %s1999_s1, 1024, %s37_s10, [#allocation7], %s1699_s21, %s1699_s21, %s1700_s22  }
  0x15   :  { %s1601_s27 = scalar_lea.hbm %s1998_s0, 2048 }
  0x16   :  { %p1602_p8 = scmp.ne.s32.totalorder %s1998_s0, %s1601_s27  ;;  %p1605_p9 = scmp.lt.u32.totalorder %s1601_s27, %s1998_s0 }
  0x18   :  { %p1607_p10 = pnand %p1605_p9, %p1602_p8 }
  0x1a   :  { %1610 = shalt.err (!%p1607_p10)
}
  0x1b   :  { %s1611_s13 = scalar_lea.vmem %s1755_s12, 2048  ;;  %p1616_p12 = scmp.lt.s32.totalorder %s1755_s12, %s1755_s12 }
  0x1c   :  { %p1612_p11 = scmp.ne.s32.totalorder %s1755_s12, %s1611_s13  ;;  %p1617_p13 = scmp.lt.s32.totalorder %s1611_s13, %s1611_s13 }
  0x1e   :  { %p1618_p0 = por %p1617_p13, %p1616_p12 }
  0x20   :  { %p1619_p1 = pnand %p1618_p0, %p1612_p11 }
  0x22   :  { %1622 = shalt.err (!%p1619_p1)
}
  0x23   :  { %30 = dma.hbm_to_vmem [thread:$0]  %s1998_s0, 2048, %s1755_s12, [#allocation4], %s1699_s21, %s1699_s21, %s1700_s22  }
  0x24   :  { %s1701_s14 = smov [#allocation8]   ;;  %s1702_s16 = smov [#allocation9]  }
  0x25   :  { %s50_s15 = sshll.u32 %s1701_s14, 4  ;;  %s64_s17 = sshll.u32 %s1702_s16, 4  ;;  %s51_s15 = int_to_ptr.vmem [resolvable:$true] %s50_s15  ;;  %s1792_s17 = int_to_ptr.vmem [resolvable:$true] %s64_s17 }
  0x26   :  { %s1623_s20 = scalar_lea.hbm %s2001_s3, 1024 }
  0x27   :  { %p1624_p2 = scmp.ne.s32.totalorder %s2001_s3, %s1623_s20  ;;  %p1627_p3 = scmp.lt.u32.totalorder %s1623_s20, %s2001_s3 }
  0x29   :  { %p1629_p4 = pnand %p1627_p3, %p1624_p2 }
  0x2b   :  { %1632 = shalt.err (!%p1629_p4)
}
  0x2c   :  { %s1633_s0 = scalar_lea.vmem %s51_s15, 1024  ;;  %p1638_p6 = scmp.lt.s32.totalorder %s51_s15, %s51_s15 }
  0x2d   :  { %p1634_p5 = scmp.ne.s32.totalorder %s51_s15, %s1633_s0  ;;  %p1639_p7 = scmp.lt.s32.totalorder %s1633_s0, %s1633_s0 }
  0x2f   :  { %p1640_p8 = por %p1639_p7, %p1638_p6 }
  0x31   :  { %p1641_p9 = pnand %p1640_p8, %p1634_p5 }
  0x33   :  { %1644 = shalt.err (!%p1641_p9)
}
  0x34   :  { %56 = dma.hbm_to_vmem [thread:$0]  %s2001_s3, 1024, %s51_s15, [#allocation7], %s1699_s21, %s1699_s21, %s1700_s22  }
  0x35   :  { %s1645_s30 = scalar_lea.hbm %s2003_s5, 1024 }
  0x36   :  { %p1646_p10 = scmp.ne.s32.totalorder %s2003_s5, %s1645_s30  ;;  %p1649_p11 = scmp.lt.u32.totalorder %s1645_s30, %s2003_s5 }
  0x38   :  { %p1651_p12 = pnand %p1649_p11, %p1646_p10 }
  0x3a   :  { %1654 = shalt.err (!%p1651_p12)
}
  0x3b   :  { %s1655_s14 = scalar_lea.vmem %s1792_s17, 1024  ;;  %p1660_p0 = scmp.lt.s32.totalorder %s1792_s17, %s1792_s17 }
  0x3c   :  { %p1656_p13 = scmp.ne.s32.totalorder %s1792_s17, %s1655_s14  ;;  %p1661_p1 = scmp.lt.s32.totalorder %s1655_s14, %s1655_s14 }
  0x3e   :  { %p1662_p2 = por %p1661_p1, %p1660_p0 }
  0x40   :  { %p1663_p3 = pnand %p1662_p2, %p1656_p13 }
  0x42   :  { %1666 = shalt.err (!%p1663_p3)
}
  0x43   :  { %70 = dma.hbm_to_vmem [thread:$0]  %s2003_s5, 1024, %s1792_s17, [#allocation10], %s1699_s21, %s1699_s21, %s1700_s22  }
  0x44   :  { %1689 = dma.done.wait [#allocation4], 2048  }
  0x45   :  { %1690 = vsyncadd [#allocation4], 4294965248 }
  0x46   :  { %1691 = dma.done.wait [#allocation7], 2048  }
  0x47   :  { %1692 = vsyncadd [#allocation7], 4294965248 }
  0x48   :  { %1693 = dma.done.wait [#allocation10], 1024  }
  0x49   :  { %1694 = vsyncadd [#allocation10], 4294966272  ;;  %v1539_v0 = vld [vmem:[#allocation6] sm:$0xff]   ;;  %v1540_v1 = vld [vmem:[#allocation6 + $0x8] sm:$0xff]   ;;  %s1704_s19 = smov [#allocation11]  }
  0x4a   :  { %1371 = vmatprep.subr.bf16.mxu0 %v1539_v0  ;;  %1515 = vmatprep.subr.bf16.mxu1 %v1539_v0  ;;  %v1541_v2 = vld [vmem:[#allocation6 + $0x10] sm:$0xff]   ;;  %v1542_v3 = vld [vmem:[#allocation6 + $0x18] sm:$0xff]   ;;  %v1547_v4 = vld [vmem:[#allocation3] sm:$0xff]   ;;  %s1227_s20 = sshll.u32 %s1704_s19, 4  ;;  %s1228_s20 = int_to_ptr.vmem [resolvable:$true] %s1227_s20 }
  0x4b   :  { %1372 = vmatpush3.bf16.msra.mxu0 %v1539_v0  ;;  %1523 = vmatpush3.bf16.msra.mxu1 %v1539_v0  ;;  %v1543_v5 = vld [vmem:[#allocation6 + $0x20] sm:$0xff]   ;;  %v1544_v6 = vld [vmem:[#allocation6 + $0x28] sm:$0xff]   ;;  %v1545_v8 = vld [vmem:[#allocation6 + $0x30] sm:$0xff]   ;;  %s1667_s23 = scalar_lea.vmem %s1228_s20, 32  ;;  %p1672_p5 = scmp.lt.s32.totalorder %s1228_s20, %s1228_s20 }
  0x4c   :  { %1373 = vmatprep.subr.bf16.mxu0 %v1540_v1  ;;  %1516 = vmatprep.subr.bf16.mxu1 %v1540_v1  ;;  %v1555_v7 = vld [vmem:[#allocation3 + $0x40] sm:$0xff]   ;;  %v1546_v9 = vld [vmem:[#allocation6 + $0x38] sm:$0xff]   ;;  %v1548_v10 = vld [vmem:[#allocation3 + $0x8] sm:$0xff]   ;;  %p1668_p4 = scmp.ne.s32.totalorder %s1228_s20, %s1667_s23  ;;  %p1673_p6 = scmp.lt.s32.totalorder %s1667_s23, %s1667_s23 }
  0x4d   :  { %1387 = vmatprep.mubr.bf16.mxu0 %v1547_v4  ;;  %1403 = vmatprep.mubr.bf16.mxu1 %v1555_v7  ;;  %v1556_v11 = vld [vmem:[#allocation3 + $0x48] sm:$0xff]   ;;  %v1563_v12 = vld [vmem:[#allocation8] sm:$0xff]   ;;  %v1549_v13 = vld [vmem:[#allocation3 + $0x10] sm:$0xff]  }
  0x4e   :  { %v1557_v14 = vld [vmem:[#allocation3 + $0x50] sm:$0xff]   ;;  %v1564_v15 = vld [vmem:[#allocation8 + $0x8] sm:$0xff]   ;;  %v1550_v17 = vld [vmem:[#allocation3 + $0x18] sm:$0xff]   ;;  %p1674_p7 = por %p1673_p6, %p1672_p5 }
  0x4f   :  { %1374 = vmatpush3.bf16.msra.mxu0 %v1540_v1  ;;  %1524 = vmatpush3.bf16.msra.mxu1 %v1540_v1  ;;  %v1565_v16 = vld [vmem:[#allocation8 + $0x10] sm:$0xff]   ;;  %v1558_v18 = vld [vmem:[#allocation3 + $0x58] sm:$0xff]   ;;  %v1551_v19 = vld [vmem:[#allocation3 + $0x20] sm:$0xff]  }
  0x50   :  { %1375 = vmatprep.subr.bf16.mxu0 %v1541_v2  ;;  %1517 = vmatprep.subr.bf16.mxu1 %v1541_v2  ;;  %v1559_v20 = vld [vmem:[#allocation3 + $0x60] sm:$0xff]   ;;  %v1566_v21 = vld [vmem:[#allocation8 + $0x18] sm:$0xff]   ;;  %v1552_v23 = vld [vmem:[#allocation3 + $0x28] sm:$0xff]   ;;  %p1675_p8 = pnand %p1674_p7, %p1668_p4 }
  0x51   :  { %v1567_v22 = vld [vmem:[#allocation8 + $0x20] sm:$0xff]   ;;  %v1560_v24 = vld [vmem:[#allocation3 + $0x68] sm:$0xff]   ;;  %v1553_v25 = vld [vmem:[#allocation3 + $0x30] sm:$0xff]  }
  0x52   :  { %v1561_v26 = vld [vmem:[#allocation3 + $0x70] sm:$0xff]   ;;  %v1554_v27 = vld [vmem:[#allocation3 + $0x38] sm:$0xff]   ;;  %v1568_v29 = vld [vmem:[#allocation8 + $0x28] sm:$0xff]  }
  0x53   :  { %1376 = vmatpush3.bf16.msra.mxu0 %v1541_v2  ;;  %1525 = vmatpush3.bf16.msra.mxu1 %v1541_v2  ;;  %v1562_v28 = vld [vmem:[#allocation3 + $0x78] sm:$0xff]   ;;  %v1569_v30 = vld [vmem:[#allocation8 + $0x30] sm:$0xff]   ;;  %v1571_v32 = vld [vmem:[#allocation9] sm:$0xff]  }
  0x54   :  { %1377 = vmatprep.subr.bf16.mxu0 %v1542_v3  ;;  %1518 = vmatprep.subr.bf16.mxu1 %v1542_v3  ;;  %v1570_v31 = vld [vmem:[#allocation8 + $0x38] sm:$0xff]   ;;  %v1572_v33 = vld [vmem:[#allocation9 + $0x8] sm:$0xff]   ;;  %v1573_v34 = vld [vmem:[#allocation9 + $0x10] sm:$0xff]  }
  0x55   :  { %v1574_v35 = vld [vmem:[#allocation9 + $0x18] sm:$0xff]   ;;  %v1575_v36 = vld [vmem:[#allocation9 + $0x20] sm:$0xff]  }
  0x56   :  { %v1832_v37 = vld [vmem:[%s2000_s2] ss:$0 sm:$0xff] }
  0x57   :  { %1378 = vmatpush3.bf16.msra.mxu0 %v1542_v3  ;;  %1526 = vmatpush3.bf16.msra.mxu1 %v1542_v3 }
  0x58   :  { %1379 = vmatprep.subr.bf16.mxu0 %v1543_v5  ;;  %1519 = vmatprep.subr.bf16.mxu1 %v1543_v5 }
  0x5b   :  { %1380 = vmatpush3.bf16.msra.mxu0 %v1543_v5  ;;  %1527 = vmatpush3.bf16.msra.mxu1 %v1543_v5 }
  0x5c   :  { %1381 = vmatprep.subr.bf16.mxu0 %v1544_v6  ;;  %1520 = vmatprep.subr.bf16.mxu1 %v1544_v6 }
  0x5f   :  { %1382 = vmatpush3.bf16.msra.mxu0 %v1544_v6  ;;  %1528 = vmatpush3.bf16.msra.mxu1 %v1544_v6 }
  0x60   :  { %1383 = vmatprep.subr.bf16.mxu0 %v1545_v8  ;;  %1521 = vmatprep.subr.bf16.mxu1 %v1545_v8 }
  0x63   :  { %1384 = vmatpush3.bf16.msra.mxu0 %v1545_v8  ;;  %1529 = vmatpush3.bf16.msra.mxu1 %v1545_v8 }
  0x64   :  { %1385 = vmatprep.subr.bf16.mxu0 %v1546_v9  ;;  %1522 = vmatprep.subr.bf16.mxu1 %v1546_v9 }
  0x67   :  { %1386 = vmatpush3.bf16.msra.mxu0 %v1546_v9  ;;  %1530 = vmatpush3.bf16.msra.mxu1 %v1546_v9 }
  0x68   :  { %1419 = vmatprep.subr.bf16.mxu1 %v1563_v12  ;;  %1467 = vmatprep.subr.bf16.mxu0 %v1571_v32 }
  0x6a   :  { %1388 = vmatmul.mubr.bf16.vlgmr.msra.gmra.mrb[0].mxu0 %v1548_v10  ;;  %1404 = vmatmul.mubr.bf16.vlgmr.msra.gmra.mrb[0].mxu1 %v1556_v11 }
  0x6b   :  { %1391 = vmatprep.mubr.bf16.mxu0 %v1549_v13  ;;  %1407 = vmatprep.mubr.bf16.mxu1 %v1557_v14 }
  0x6c   :  { %1420 = vmatpush3.bf16.msra.mxu1 %v1563_v12  ;;  %1468 = vmatpush3.bf16.msra.mxu0 %v1571_v32 }
  0x6d   :  { %1421 = vmatprep.subr.bf16.mxu1 %v1564_v15  ;;  %1469 = vmatprep.subr.bf16.mxu0 %v1572_v33 }
  0x70   :  { %1422 = vmatpush3.bf16.msra.mxu1 %v1564_v15  ;;  %1470 = vmatpush3.bf16.msra.mxu0 %v1572_v33 }
  0x71   :  { %1423 = vmatprep.subr.bf16.mxu1 %v1565_v16  ;;  %1471 = vmatprep.subr.bf16.mxu0 %v1573_v34 }
  0x72   :  { %1392 = vmatmul.mubr.bf16.gmra.mrb[4].mxu0 %v1550_v17  ;;  %1408 = vmatmul.mubr.bf16.gmra.mrb[4].mxu1 %v1558_v18 }
  0x73   :  { %1395 = vmatprep.mubr.bf16.mxu0 %v1551_v19  ;;  %1411 = vmatprep.mubr.bf16.mxu1 %v1559_v20 }
  0x74   :  { %1424 = vmatpush3.bf16.msra.mxu1 %v1565_v16  ;;  %1472 = vmatpush3.bf16.msra.mxu0 %v1573_v34 }
  0x75   :  { %1425 = vmatprep.subr.bf16.mxu1 %v1566_v21  ;;  %1473 = vmatprep.subr.bf16.mxu0 %v1574_v35 }
  0x78   :  { %1426 = vmatpush3.bf16.msra.mxu1 %v1566_v21  ;;  %1474 = vmatpush3.bf16.msra.mxu0 %v1574_v35 }
  0x79   :  { %1427 = vmatprep.subr.bf16.mxu1 %v1567_v22  ;;  %1475 = vmatprep.subr.bf16.mxu0 %v1575_v36 }
  0x7a   :  { %1396 = vmatmul.mubr.bf16.gmra.mrb[8].mxu0 %v1552_v23  ;;  %1412 = vmatmul.mubr.bf16.gmra.mrb[8].mxu1 %v1560_v24 }
  0x7b   :  { %1399 = vmatprep.mubr.bf16.mxu0 %v1553_v25  ;;  %1415 = vmatprep.mubr.bf16.mxu1 %v1561_v26 }
  0x7c   :  { %1428 = vmatpush3.bf16.msra.mxu1 %v1567_v22  ;;  %1476 = vmatpush3.bf16.msra.mxu0 %v1575_v36 }
  0x7d   :  { %1429 = vmatprep.subr.bf16.mxu1 %v1568_v29 }
  0x80   :  { %1430 = vmatpush3.bf16.msra.mxu1 %v1568_v29 }
  0x81   :  { %1431 = vmatprep.subr.bf16.mxu1 %v1569_v30 }
  0x82   :  { %1400 = vmatmul.mubr.bf16.gmra.mrb[12].mxu0 %v1554_v27  ;;  %1416 = vmatmul.mubr.bf16.gmra.mrb[12].mxu1 %v1562_v28 }
  0x84   :  { %1432 = vmatpush3.bf16.msra.mxu1 %v1569_v30 }
  0x85   :  { %1433 = vmatprep.subr.bf16.mxu1 %v1570_v31 }
  0x88   :  { %1434 = vmatpush3.bf16.msra.mxu1 %v1570_v31 }
 0x13d   :  { %v1389_v38 = vpop.f32.mrb[0].mxu0  ;;  %v1405_v39 = vpop.f32.mrb[0].mxu1 }
 0x13e   :  { %v332_v40 = vadd.f32 %v1389_v38, %v1832_v37  ;;  %v323_v41 = vpop.f32.mrb[1].mxu0  ;;  %v396_v42 = vadd.f32 %v1405_v39, %v1832_v37  ;;  %v387_v43 = vpop.f32.mrb[1].mxu1 }
 0x13f   :  { %v324_v44 = vadd.f32 %v1832_v37, %v323_v41  ;;  %v1390_v45 = vpop.f32.mrb[2].mxu0  ;;  %v388_v46 = vadd.f32 %v1832_v37, %v387_v43  ;;  %v1406_v47 = vpop.f32.mrb[2].mxu1 }
 0x140   :  { %v452_v48 = vmul.f32 0.01, %v332_v40  ;;  %v335_v49 = vadd.f32 %v1390_v45, %v1832_v37  ;;  %v326_v50 = vpop.f32.mrb[3].mxu0  ;;  %v468_v51 = vmul.f32 0.01, %v396_v42  ;;  %v399_v52 = vadd.f32 %v1406_v47, %v1832_v37  ;;  %v390_v53 = vpop.f32.mrb[3].mxu1 }
 0x141   :  { %v450_v54 = vmul.f32 0.01, %v324_v44  ;;  %v327_v55 = vadd.f32 %v1832_v37, %v326_v50  ;;  %v466_v56 = vmul.f32 0.01, %v388_v46  ;;  %v391_v57 = vadd.f32 %v1832_v37, %v390_v53 }
 0x142   :  { %v453_v58 = vmul.f32 0.01, %v335_v49  ;;  %v500_v59 = vmax.f32 %v396_v42, %v468_v51  ;;  %v469_v60 = vmul.f32 0.01, %v399_v52  ;;  %v484_v0 = vmax.f32 %v332_v40, %v452_v48 }
 0x143   :  { %v451_v61 = vmul.f32 0.01, %v327_v55  ;;  %v498_v62 = vmax.f32 %v388_v46, %v466_v56  ;;  %v467_v63 = vmul.f32 0.01, %v391_v57  ;;  %v482_v3 = vmax.f32 %v324_v44, %v450_v54 }
 0x144   :  { %v485_v1 = vmax.f32 %v335_v49, %v453_v58  ;;  %v501_v2 = vmax.f32 %v399_v52, %v469_v60 }
 0x145   :  { %v483_v4 = vmax.f32 %v327_v55, %v451_v61  ;;  %v1393_v5 = vpop.f32.mrb[4].mxu0  ;;  %v499_v6 = vmax.f32 %v391_v57, %v467_v63  ;;  %v1409_v7 = vpop.f32.mrb[4].mxu1 }
 0x146   :  { %v515_v8 = vpack.c.bf16 %v485_v1, %v484_v0  ;;  %v348_v9 = vadd.f32 %v1393_v5, %v1832_v37  ;;  %v339_v10 = vpop.f32.mrb[5].mxu0  ;;  %v412_v11 = vadd.f32 %v1409_v7, %v1832_v37  ;;  %v403_v12 = vpop.f32.mrb[5].mxu1  ;;  %v1844_v13 = vpack.c.bf16 %v501_v2, %v500_v59 }
 0x147   :  { %v340_v14 = vadd.f32 %v1832_v37, %v339_v10  ;;  %v1394_v15 = vpop.f32.mrb[6].mxu0  ;;  %v514_v16 = vpack.c.bf16 %v483_v4, %v482_v3  ;;  %v1847_v17 = vpack.c.bf16 %v499_v6, %v498_v62  ;;  %v404_v18 = vadd.f32 %v1832_v37, %v403_v12  ;;  %v1410_v19 = vpop.f32.mrb[6].mxu1 }
 0x148   :  { %v456_v20 = vmul.f32 0.01, %v348_v9  ;;  %v351_v21 = vadd.f32 %v1394_v15, %v1832_v37  ;;  %v342_v22 = vpop.f32.mrb[7].mxu0  ;;  %v472_v23 = vmul.f32 0.01, %v412_v11  ;;  %v415_v24 = vadd.f32 %v1410_v19, %v1832_v37  ;;  %v406_v25 = vpop.f32.mrb[7].mxu1 }
 0x149   :  { %v454_v26 = vmul.f32 0.01, %v340_v14  ;;  %v343_v27 = vadd.f32 %v1832_v37, %v342_v22  ;;  %1435 = vmatprep.mubr.bf16.mxu1 %v514_v16  ;;  %v470_v28 = vmul.f32 0.01, %v404_v18  ;;  %v407_v29 = vadd.f32 %v1832_v37, %v406_v25 }
 0x14a   :  { %v457_v30 = vmul.f32 0.01, %v351_v21  ;;  %1436 = vmatmul.mubr.bf16.vlgmr.msra.gmra.mrb[16].mxu1 %v515_v8  ;;  %v504_v31 = vmax.f32 %v412_v11, %v472_v23  ;;  %v473_v32 = vmul.f32 0.01, %v415_v24  ;;  %v488_v36 = vmax.f32 %v348_v9, %v456_v20 }
 0x14b   :  { %v455_v33 = vmul.f32 0.01, %v343_v27  ;;  %v502_v34 = vmax.f32 %v404_v18, %v470_v28  ;;  %v471_v35 = vmul.f32 0.01, %v407_v29  ;;  %v486_v40 = vmax.f32 %v340_v14, %v454_v26 }
 0x14c   :  { %v489_v38 = vmax.f32 %v351_v21, %v457_v30  ;;  %v505_v39 = vmax.f32 %v415_v24, %v473_v32 }
 0x14d   :  { %v487_v41 = vmax.f32 %v343_v27, %v455_v33  ;;  %v1397_v42 = vpop.f32.mrb[8].mxu0  ;;  %v503_v43 = vmax.f32 %v407_v29, %v471_v35  ;;  %v1413_v44 = vpop.f32.mrb[8].mxu1 }
 0x14e   :  { %v364_v45 = vadd.f32 %v1397_v42, %v1832_v37  ;;  %v355_v46 = vpop.f32.mrb[9].mxu0  ;;  %v517_v47 = vpack.c.bf16 %v489_v38, %v488_v36  ;;  %v428_v48 = vadd.f32 %v1413_v44, %v1832_v37  ;;  %v419_v49 = vpop.f32.mrb[9].mxu1  ;;  %v1856_v50 = vpack.c.bf16 %v505_v39, %v504_v31 }
 0x14f   :  { %v356_v51 = vadd.f32 %v1832_v37, %v355_v46  ;;  %v1398_v52 = vpop.f32.mrb[10].mxu0  ;;  %v516_v53 = vpack.c.bf16 %v487_v41, %v486_v40  ;;  %v420_v54 = vadd.f32 %v1832_v37, %v419_v49  ;;  %v1414_v55 = vpop.f32.mrb[10].mxu1  ;;  %v1860_v56 = vpack.c.bf16 %v503_v43, %v502_v34 }
 0x150   :  { %v460_v57 = vmul.f32 0.01, %v364_v45  ;;  %v367_v58 = vadd.f32 %v1398_v52, %v1832_v37  ;;  %v358_v59 = vpop.f32.mrb[11].mxu0  ;;  %v476_v60 = vmul.f32 0.01, %v428_v48  ;;  %v431_v61 = vadd.f32 %v1414_v55, %v1832_v37  ;;  %v422_v62 = vpop.f32.mrb[11].mxu1 }
 0x151   :  { %v458_v63 = vmul.f32 0.01, %v356_v51  ;;  %v359_v0 = vadd.f32 %v1832_v37, %v358_v59  ;;  %1439 = vmatprep.mubr.bf16.mxu1 %v516_v53  ;;  %v474_v1 = vmul.f32 0.01, %v420_v54  ;;  %v423_v2 = vadd.f32 %v1832_v37, %v422_v62 }
 0x152   :  { %v461_v3 = vmul.f32 0.01, %v367_v58  ;;  %1440 = vmatmul.mubr.bf16.gmra.mrb[20].mxu1 %v517_v47  ;;  %v508_v4 = vmax.f32 %v428_v48, %v476_v60  ;;  %v477_v5 = vmul.f32 0.01, %v431_v61  ;;  %v492_v9 = vmax.f32 %v364_v45, %v460_v57  ;;  %v1577_v60 = vld [vmem:[#allocation9 + $0x30] sm:$0xff]  }
 0x153   :  { %v459_v6 = vmul.f32 0.01, %v359_v0  ;;  %v506_v7 = vmax.f32 %v420_v54, %v474_v1  ;;  %v475_v8 = vmul.f32 0.01, %v423_v2  ;;  %v490_v12 = vmax.f32 %v356_v51, %v458_v63 }
 0x154   :  { %v493_v10 = vmax.f32 %v367_v58, %v461_v3  ;;  %v509_v11 = vmax.f32 %v431_v61, %v477_v5  ;;  %v1578_v61 = vld [vmem:[#allocation9 + $0x38] sm:$0xff]  }
 0x155   :  { %v491_v14 = vmax.f32 %v359_v0, %v459_v6  ;;  %v1401_v15 = vpop.f32.mrb[12].mxu0  ;;  %v507_v16 = vmax.f32 %v423_v2, %v475_v8  ;;  %v1417_v18 = vpop.f32.mrb[12].mxu1 }
 0x156   :  { %v380_v19 = vadd.f32 %v1401_v15, %v1832_v37  ;;  %v371_v20 = vpop.f32.mrb[13].mxu0  ;;  %v519_v21 = vpack.c.bf16 %v493_v10, %v492_v9  ;;  %v527_v22 = vpack.c.bf16 %v509_v11, %v508_v4  ;;  %v444_v23 = vadd.f32 %v1417_v18, %v1832_v37  ;;  %v435_v24 = vpop.f32.mrb[13].mxu1 }
 0x157   :  { %v372_v25 = vadd.f32 %v1832_v37, %v371_v20  ;;  %v1402_v26 = vpop.f32.mrb[14].mxu0  ;;  %v518_v27 = vpack.c.bf16 %v491_v14, %v490_v12  ;;  %v526_v28 = vpack.c.bf16 %v507_v16, %v506_v7  ;;  %v436_v29 = vadd.f32 %v1832_v37, %v435_v24  ;;  %v1418_v30 = vpop.f32.mrb[14].mxu1 }
 0x158   :  { %v464_v31 = vmul.f32 0.01, %v380_v19  ;;  %v383_v32 = vadd.f32 %v1402_v26, %v1832_v37  ;;  %v374_v33 = vpop.f32.mrb[15].mxu0  ;;  %v480_v34 = vmul.f32 0.01, %v444_v23  ;;  %v447_v35 = vadd.f32 %v1418_v30, %v1832_v37  ;;  %v438_v36 = vpop.f32.mrb[15].mxu1 }
 0x159   :  { %v462_v38 = vmul.f32 0.01, %v372_v25  ;;  %v375_v39 = vadd.f32 %v1832_v37, %v374_v33  ;;  %1443 = vmatprep.mubr.bf16.mxu1 %v518_v27  ;;  %v478_v40 = vmul.f32 0.01, %v436_v29  ;;  %v439_v41 = vadd.f32 %v1832_v37, %v438_v36  ;;  %v1576_v37 = vld [vmem:[#allocation9 + $0x28] sm:$0xff]  }
 0x15a   :  { %v465_v42 = vmul.f32 0.01, %v383_v32  ;;  %1444 = vmatmul.mubr.bf16.gmra.mrb[24].mxu1 %v519_v21  ;;  %v512_v43 = vmax.f32 %v444_v23, %v480_v34  ;;  %v481_v44 = vmul.f32 0.01, %v447_v35  ;;  %v496_v48 = vmax.f32 %v380_v19, %v464_v31  ;;  %1477 = vmatprep.subr.bf16.mxu0 %v1576_v37 }
 0x15b   :  { %v463_v45 = vmul.f32 0.01, %v375_v39  ;;  %v510_v46 = vmax.f32 %v436_v29, %v478_v40  ;;  %v479_v47 = vmul.f32 0.01, %v439_v41  ;;  %v494_v52 = vmax.f32 %v372_v25, %v462_v38  ;;  %1478 = vmatpush3.bf16.msra.mxu0 %v1576_v37 }
 0x15c   :  { %v497_v49 = vmax.f32 %v383_v32, %v465_v42  ;;  %v513_v51 = vmax.f32 %v447_v35, %v481_v44  ;;  %1479 = vmatprep.subr.bf16.mxu0 %v1577_v60 }
 0x15d   :  { %v495_v53 = vmax.f32 %v375_v39, %v463_v45  ;;  %v511_v54 = vmax.f32 %v439_v41, %v479_v47 }
 0x15e   :  { %v521_v55 = vpack.c.bf16 %v497_v49, %v496_v48  ;;  %v529_v57 = vpack.c.bf16 %v513_v51, %v512_v43 }
 0x15f   :  { %v520_v58 = vpack.c.bf16 %v495_v53, %v494_v52  ;;  %v528_v59 = vpack.c.bf16 %v511_v54, %v510_v46  ;;  %1480 = vmatpush3.bf16.msra.mxu0 %v1577_v60 }
 0x160   :  { %1481 = vmatprep.subr.bf16.mxu0 %v1578_v61 }
 0x161   :  { %1447 = vmatprep.mubr.bf16.mxu1 %v520_v58 }
 0x162   :  { %1448 = vmatmul.mubr.bf16.gmra.mrb[28].mxu1 %v521_v55 }
 0x163   :  { %1451 = vmatprep.mubr.bf16.mxu1 %v1847_v17  ;;  %1482 = vmatpush3.bf16.msra.mxu0 %v1578_v61 }
 0x16a   :  { %1452 = vmatmul.mubr.bf16.gmra.mrb[32].mxu1 %v1844_v13  ;;  %v1881_v13 = vld [vmem:[%s2002_s4] ss:$0 sm:$0xff] }
 0x16b   :  { %1455 = vmatprep.mubr.bf16.mxu1 %v1860_v56 }
 0x172   :  { %1456 = vmatmul.mubr.bf16.gmra.mrb[36].mxu1 %v1856_v50 }
 0x173   :  { %1459 = vmatprep.mubr.bf16.mxu1 %v526_v28 }
 0x17a   :  { %1460 = vmatmul.mubr.bf16.gmra.mrb[40].mxu1 %v527_v22 }
 0x17b   :  { %1463 = vmatprep.mubr.bf16.mxu1 %v528_v59 }
 0x182   :  { %1464 = vmatmul.mubr.bf16.gmra.mrb[44].mxu1 %v529_v57 }
 0x21d   :  { %v1437_v17 = vpop.f32.mrb[16].mxu1 }
 0x21e   :  { %v644_v50 = vadd.f32 %v1437_v17, %v1881_v13  ;;  %v635_v56 = vpop.f32.mrb[17].mxu1 }
 0x21f   :  { %v636_v62 = vadd.f32 %v1881_v13, %v635_v56  ;;  %v1438_v63 = vpop.f32.mrb[18].mxu1 }
 0x220   :  { %v764_v0 = vmul.f32 0.01, %v644_v50  ;;  %v647_v1 = vadd.f32 %v1438_v63, %v1881_v13  ;;  %v638_v2 = vpop.f32.mrb[19].mxu1 }
 0x221   :  { %v762_v3 = vmul.f32 0.01, %v636_v62  ;;  %v639_v4 = vadd.f32 %v1881_v13, %v638_v2 }
 0x222   :  { %v765_v5 = vmul.f32 0.01, %v647_v1  ;;  %v796_v7 = vmax.f32 %v644_v50, %v764_v0 }
 0x223   :  { %v763_v6 = vmul.f32 0.01, %v639_v4  ;;  %v794_v9 = vmax.f32 %v636_v62, %v762_v3 }
 0x224   :  { %v797_v8 = vmax.f32 %v647_v1, %v765_v5 }
 0x225   :  { %v795_v10 = vmax.f32 %v639_v4, %v763_v6  ;;  %v1441_v11 = vpop.f32.mrb[20].mxu1 }
 0x226   :  { %v827_v12 = vpack.c.bf16 %v797_v8, %v796_v7  ;;  %v660_v14 = vadd.f32 %v1441_v11, %v1881_v13  ;;  %v651_v15 = vpop.f32.mrb[21].mxu1 }
 0x227   :  { %v652_v16 = vadd.f32 %v1881_v13, %v651_v15  ;;  %v1442_v18 = vpop.f32.mrb[22].mxu1  ;;  %v826_v19 = vpack.c.bf16 %v795_v10, %v794_v9 }
 0x228   :  { %v768_v20 = vmul.f32 0.01, %v660_v14  ;;  %v663_v21 = vadd.f32 %v1442_v18, %v1881_v13  ;;  %v654_v22 = vpop.f32.mrb[23].mxu1 }
 0x229   :  { %v766_v23 = vmul.f32 0.01, %v652_v16  ;;  %v655_v24 = vadd.f32 %v1881_v13, %v654_v22  ;;  %1483 = vmatprep.mubr.bf16.mxu0 %v826_v19 }
 0x22a   :  { %v769_v25 = vmul.f32 0.01, %v663_v21  ;;  %1484 = vmatmul.mubr.bf16.vlgmr.msra.gmra.mrb[16].mxu0 %v827_v12  ;;  %v800_v27 = vmax.f32 %v660_v14, %v768_v20 }
 0x22b   :  { %v767_v26 = vmul.f32 0.01, %v655_v24  ;;  %v798_v29 = vmax.f32 %v652_v16, %v766_v23 }
 0x22c   :  { %v801_v28 = vmax.f32 %v663_v21, %v769_v25 }
 0x22d   :  { %v799_v30 = vmax.f32 %v655_v24, %v767_v26  ;;  %v1445_v31 = vpop.f32.mrb[24].mxu1 }
 0x22e   :  { %v676_v32 = vadd.f32 %v1445_v31, %v1881_v13  ;;  %v667_v33 = vpop.f32.mrb[25].mxu1  ;;  %v829_v34 = vpack.c.bf16 %v801_v28, %v800_v27 }
 0x22f   :  { %v668_v35 = vadd.f32 %v1881_v13, %v667_v33  ;;  %v1446_v36 = vpop.f32.mrb[26].mxu1  ;;  %v828_v38 = vpack.c.bf16 %v799_v30, %v798_v29 }
 0x230   :  { %v772_v39 = vmul.f32 0.01, %v676_v32  ;;  %v679_v40 = vadd.f32 %v1446_v36, %v1881_v13  ;;  %v670_v41 = vpop.f32.mrb[27].mxu1 }
 0x231   :  { %v770_v42 = vmul.f32 0.01, %v668_v35  ;;  %v671_v43 = vadd.f32 %v1881_v13, %v670_v41  ;;  %1487 = vmatprep.mubr.bf16.mxu0 %v828_v38 }
 0x232   :  { %v773_v44 = vmul.f32 0.01, %v679_v40  ;;  %1488 = vmatmul.mubr.bf16.gmra.mrb[20].mxu0 %v829_v34  ;;  %v804_v46 = vmax.f32 %v676_v32, %v772_v39 }
 0x233   :  { %v771_v45 = vmul.f32 0.01, %v671_v43  ;;  %v802_v48 = vmax.f32 %v668_v35, %v770_v42 }
 0x234   :  { %v805_v47 = vmax.f32 %v679_v40, %v773_v44 }
 0x235   :  { %v803_v49 = vmax.f32 %v671_v43, %v771_v45  ;;  %v1449_v51 = vpop.f32.mrb[28].mxu1 }
 0x236   :  { %v692_v52 = vadd.f32 %v1449_v51, %v1881_v13  ;;  %v683_v53 = vpop.f32.mrb[29].mxu1  ;;  %v831_v54 = vpack.c.bf16 %v805_v47, %v804_v46 }
 0x237   :  { %v684_v55 = vadd.f32 %v1881_v13, %v683_v53  ;;  %v1450_v57 = vpop.f32.mrb[30].mxu1  ;;  %v830_v58 = vpack.c.bf16 %v803_v49, %v802_v48 }
 0x238   :  { %v776_v59 = vmul.f32 0.01, %v692_v52  ;;  %v695_v37 = vadd.f32 %v1450_v57, %v1881_v13  ;;  %v686_v60 = vpop.f32.mrb[31].mxu1 }
 0x239   :  { %v774_v61 = vmul.f32 0.01, %v684_v55  ;;  %v687_v17 = vadd.f32 %v1881_v13, %v686_v60  ;;  %1491 = vmatprep.mubr.bf16.mxu0 %v830_v58 }
 0x23a   :  { %v777_v50 = vmul.f32 0.01, %v695_v37  ;;  %1492 = vmatmul.mubr.bf16.gmra.mrb[24].mxu0 %v831_v54  ;;  %v808_v62 = vmax.f32 %v692_v52, %v776_v59 }
 0x23b   :  { %v775_v56 = vmul.f32 0.01, %v687_v17  ;;  %v806_v0 = vmax.f32 %v684_v55, %v774_v61 }
 0x23c   :  { %v809_v63 = vmax.f32 %v695_v37, %v777_v50 }
 0x23d   :  { %v807_v1 = vmax.f32 %v687_v17, %v775_v56  ;;  %v1453_v2 = vpop.f32.mrb[32].mxu1 }
 0x23e   :  { %v708_v3 = vadd.f32 %v1453_v2, %v1881_v13  ;;  %v699_v4 = vpop.f32.mrb[33].mxu1  ;;  %v833_v5 = vpack.c.bf16 %v809_v63, %v808_v62 }
 0x23f   :  { %v700_v6 = vadd.f32 %v1881_v13, %v699_v4  ;;  %v1454_v7 = vpop.f32.mrb[34].mxu1  ;;  %v832_v8 = vpack.c.bf16 %v807_v1, %v806_v0 }
 0x240   :  { %v780_v9 = vmul.f32 0.01, %v708_v3  ;;  %v711_v10 = vadd.f32 %v1454_v7, %v1881_v13  ;;  %v702_v11 = vpop.f32.mrb[35].mxu1 }
 0x241   :  { %v778_v12 = vmul.f32 0.01, %v700_v6  ;;  %v703_v14 = vadd.f32 %v1881_v13, %v702_v11  ;;  %1495 = vmatprep.mubr.bf16.mxu0 %v832_v8 }
 0x242   :  { %v781_v15 = vmul.f32 0.01, %v711_v10  ;;  %1496 = vmatmul.mubr.bf16.gmra.mrb[28].mxu0 %v833_v5  ;;  %v812_v18 = vmax.f32 %v708_v3, %v780_v9 }
 0x243   :  { %v779_v16 = vmul.f32 0.01, %v703_v14  ;;  %v810_v20 = vmax.f32 %v700_v6, %v778_v12 }
 0x244   :  { %v813_v19 = vmax.f32 %v711_v10, %v781_v15 }
 0x245   :  { %v811_v21 = vmax.f32 %v703_v14, %v779_v16  ;;  %v1457_v22 = vpop.f32.mrb[36].mxu1  ;;  %v1918_v14 = vld [vmem:[%s2005_s7] sm:$0x1] }
 0x246   :  { %v724_v23 = vadd.f32 %v1457_v22, %v1881_v13  ;;  %v715_v24 = vpop.f32.mrb[37].mxu1  ;;  %v835_v25 = vpack.c.bf16 %v813_v19, %v812_v18  ;;  %1369 = vmatprep.mubr.bf16.mxu1 %v1918_v14 }
 0x247   :  { %v716_v26 = vadd.f32 %v1881_v13, %v715_v24  ;;  %v1458_v27 = vpop.f32.mrb[38].mxu1  ;;  %v834_v28 = vpack.c.bf16 %v811_v21, %v810_v20 }
 0x248   :  { %v784_v29 = vmul.f32 0.01, %v724_v23  ;;  %v727_v30 = vadd.f32 %v1458_v27, %v1881_v13  ;;  %v718_v31 = vpop.f32.mrb[39].mxu1 }
 0x249   :  { %v782_v32 = vmul.f32 0.01, %v716_v26  ;;  %v719_v33 = vadd.f32 %v1881_v13, %v718_v31  ;;  %1499 = vmatprep.mubr.bf16.mxu0 %v834_v28 }
 0x24a   :  { %v785_v34 = vmul.f32 0.01, %v727_v30  ;;  %1500 = vmatmul.mubr.bf16.gmra.mrb[32].mxu0 %v835_v25  ;;  %v816_v36 = vmax.f32 %v724_v23, %v784_v29 }
 0x24b   :  { %v783_v35 = vmul.f32 0.01, %v719_v33  ;;  %v814_v39 = vmax.f32 %v716_v26, %v782_v32 }
 0x24c   :  { %v817_v38 = vmax.f32 %v727_v30, %v785_v34 }
 0x24d   :  { %v815_v40 = vmax.f32 %v719_v33, %v783_v35  ;;  %v1461_v41 = vpop.f32.mrb[40].mxu1 }
 0x24e   :  { %v740_v42 = vadd.f32 %v1461_v41, %v1881_v13  ;;  %v731_v43 = vpop.f32.mrb[41].mxu1  ;;  %v837_v44 = vpack.c.bf16 %v817_v38, %v816_v36 }
 0x24f   :  { %v732_v45 = vadd.f32 %v1881_v13, %v731_v43  ;;  %v1462_v46 = vpop.f32.mrb[42].mxu1  ;;  %v836_v47 = vpack.c.bf16 %v815_v40, %v814_v39 }
 0x250   :  { %v788_v48 = vmul.f32 0.01, %v740_v42  ;;  %v743_v49 = vadd.f32 %v1462_v46, %v1881_v13  ;;  %v734_v51 = vpop.f32.mrb[43].mxu1 }
 0x251   :  { %v786_v52 = vmul.f32 0.01, %v732_v45  ;;  %v735_v53 = vadd.f32 %v1881_v13, %v734_v51  ;;  %1503 = vmatprep.mubr.bf16.mxu0 %v836_v47 }
 0x252   :  { %v820_v54 = vmax.f32 %v740_v42, %v788_v48  ;;  %v789_v55 = vmul.f32 0.01, %v743_v49  ;;  %1504 = vmatmul.mubr.bf16.gmra.mrb[36].mxu0 %v837_v44 }
 0x253   :  { %v818_v57 = vmax.f32 %v732_v45, %v786_v52  ;;  %v787_v58 = vmul.f32 0.01, %v735_v53 }
 0x254   :  { %v821_v59 = vmax.f32 %v743_v49, %v789_v55 }
 0x255   :  { %v819_v37 = vmax.f32 %v735_v53, %v787_v58  ;;  %v1465_v60 = vpop.f32.mrb[44].mxu1 }
 0x256   :  { %v839_v61 = vpack.c.bf16 %v821_v59, %v820_v54  ;;  %v756_v17 = vadd.f32 %v1465_v60, %v1881_v13  ;;  %v747_v50 = vpop.f32.mrb[45].mxu1 }
 0x257   :  { %v838_v56 = vpack.c.bf16 %v819_v37, %v818_v57  ;;  %v748_v62 = vadd.f32 %v1881_v13, %v747_v50  ;;  %v1466_v63 = vpop.f32.mrb[46].mxu1 }
 0x258   :  { %v792_v0 = vmul.f32 0.01, %v756_v17  ;;  %v759_v1 = vadd.f32 %v1466_v63, %v1881_v13  ;;  %v750_v2 = vpop.f32.mrb[47].mxu1 }
 0x259   :  { %1507 = vmatprep.mubr.bf16.mxu0 %v838_v56  ;;  %v790_v3 = vmul.f32 0.01, %v748_v62  ;;  %v751_v4 = vadd.f32 %v1881_v13, %v750_v2  ;;  %v1924_v13 = vld [vmem:[%s2004_s6] ss:$0 sm:$0xff] }
 0x25a   :  { %1508 = vmatmul.mubr.bf16.gmra.mrb[40].mxu0 %v839_v61  ;;  %v824_v5 = vmax.f32 %v756_v17, %v792_v0  ;;  %v793_v6 = vmul.f32 0.01, %v759_v1 }
 0x25b   :  { %v822_v7 = vmax.f32 %v748_v62, %v790_v3  ;;  %v791_v8 = vmul.f32 0.01, %v751_v4 }
 0x25c   :  { %v825_v9 = vmax.f32 %v759_v1, %v793_v6 }
 0x25d   :  { %v823_v10 = vmax.f32 %v751_v4, %v791_v8 }
 0x25e   :  { %v841_v11 = vpack.c.bf16 %v825_v9, %v824_v5 }
 0x25f   :  { %v840_v12 = vpack.c.bf16 %v823_v10, %v822_v7 }
 0x261   :  { %1511 = vmatprep.mubr.bf16.mxu0 %v840_v12 }
 0x262   :  { %1512 = vmatmul.mubr.bf16.gmra.mrb[44].mxu0 %v841_v11 }
 0x2fd   :  { %v1485_v15 = vpop.f32.mrb[16].mxu0 }
 0x2fe   :  { %v956_v16 = vadd.f32 %v1485_v15, %v1924_v13  ;;  %v947_v18 = vpop.f32.mrb[17].mxu0 }
 0x2ff   :  { %v948_v19 = vadd.f32 %v1924_v13, %v947_v18  ;;  %v1486_v20 = vpop.f32.mrb[18].mxu0 }
 0x300   :  { %v1076_v21 = vmul.f32 0.01, %v956_v16  ;;  %v959_v22 = vadd.f32 %v1486_v20, %v1924_v13  ;;  %v950_v23 = vpop.f32.mrb[19].mxu0 }
 0x301   :  { %v1074_v24 = vmul.f32 0.01, %v948_v19  ;;  %v951_v25 = vadd.f32 %v1924_v13, %v950_v23 }
 0x302   :  { %v1077_v26 = vmul.f32 0.01, %v959_v22  ;;  %v1108_v28 = vmax.f32 %v956_v16, %v1076_v21 }
 0x303   :  { %v1075_v27 = vmul.f32 0.01, %v951_v25  ;;  %v1106_v30 = vmax.f32 %v948_v19, %v1074_v24 }
 0x304   :  { %v1109_v29 = vmax.f32 %v959_v22, %v1077_v26 }
 0x305   :  { %v1107_v31 = vmax.f32 %v951_v25, %v1075_v27  ;;  %v1489_v32 = vpop.f32.mrb[20].mxu0 }
 0x306   :  { %v1930_v33 = vpack.c.bf16 %v1109_v29, %v1108_v28  ;;  %v972_v34 = vadd.f32 %v1489_v32, %v1924_v13  ;;  %v963_v35 = vpop.f32.mrb[21].mxu0 }
 0x307   :  { %v1933_v36 = vpack.c.bf16 %v1107_v31, %v1106_v30  ;;  %v964_v38 = vadd.f32 %v1924_v13, %v963_v35  ;;  %v1490_v39 = vpop.f32.mrb[22].mxu0 }
 0x308   :  { %v1080_v40 = vmul.f32 0.01, %v972_v34  ;;  %v975_v41 = vadd.f32 %v1490_v39, %v1924_v13  ;;  %v966_v42 = vpop.f32.mrb[23].mxu0 }
 0x309   :  { %v1078_v43 = vmul.f32 0.01, %v964_v38  ;;  %v967_v44 = vadd.f32 %v1924_v13, %v966_v42 }
 0x30a   :  { %v1081_v45 = vmul.f32 0.01, %v975_v41  ;;  %v1112_v47 = vmax.f32 %v972_v34, %v1080_v40 }
 0x30b   :  { %v1079_v46 = vmul.f32 0.01, %v967_v44  ;;  %v1110_v49 = vmax.f32 %v964_v38, %v1078_v43 }
 0x30c   :  { %v1113_v48 = vmax.f32 %v975_v41, %v1081_v45 }
 0x30d   :  { %v1111_v51 = vmax.f32 %v967_v44, %v1079_v46  ;;  %v1493_v52 = vpop.f32.mrb[24].mxu0 }
 0x30e   :  { %v1938_v53 = vpack.c.bf16 %v1113_v48, %v1112_v47  ;;  %v988_v54 = vadd.f32 %v1493_v52, %v1924_v13  ;;  %v979_v55 = vpop.f32.mrb[25].mxu0 }
 0x30f   :  { %v1941_v57 = vpack.c.bf16 %v1111_v51, %v1110_v49  ;;  %v980_v58 = vadd.f32 %v1924_v13, %v979_v55  ;;  %v1494_v59 = vpop.f32.mrb[26].mxu0 }
 0x310   :  { %v1084_v37 = vmul.f32 0.01, %v988_v54  ;;  %v991_v60 = vadd.f32 %v1494_v59, %v1924_v13  ;;  %v982_v61 = vpop.f32.mrb[27].mxu0 }
 0x311   :  { %v1082_v17 = vmul.f32 0.01, %v980_v58  ;;  %v983_v50 = vadd.f32 %v1924_v13, %v982_v61 }
 0x312   :  { %v1085_v56 = vmul.f32 0.01, %v991_v60  ;;  %v1116_v63 = vmax.f32 %v988_v54, %v1084_v37 }
 0x313   :  { %v1083_v62 = vmul.f32 0.01, %v983_v50  ;;  %v1114_v1 = vmax.f32 %v980_v58, %v1082_v17 }
 0x314   :  { %v1117_v0 = vmax.f32 %v991_v60, %v1085_v56 }
 0x315   :  { %v1115_v2 = vmax.f32 %v983_v50, %v1083_v62  ;;  %v1497_v3 = vpop.f32.mrb[28].mxu0 }
 0x316   :  { %v1946_v4 = vpack.c.bf16 %v1117_v0, %v1116_v63  ;;  %v1004_v5 = vadd.f32 %v1497_v3, %v1924_v13  ;;  %v995_v6 = vpop.f32.mrb[29].mxu0 }
 0x317   :  { %v1949_v7 = vpack.c.bf16 %v1115_v2, %v1114_v1  ;;  %v996_v8 = vadd.f32 %v1924_v13, %v995_v6  ;;  %v1498_v9 = vpop.f32.mrb[30].mxu0 }
 0x318   :  { %v1088_v10 = vmul.f32 0.01, %v1004_v5  ;;  %v1007_v11 = vadd.f32 %v1498_v9, %v1924_v13  ;;  %v998_v12 = vpop.f32.mrb[31].mxu0 }
 0x319   :  { %v1086_v15 = vmul.f32 0.01, %v996_v8  ;;  %v999_v16 = vadd.f32 %v1924_v13, %v998_v12 }
 0x31a   :  { %v1089_v18 = vmul.f32 0.01, %v1007_v11  ;;  %v1120_v20 = vmax.f32 %v1004_v5, %v1088_v10 }
 0x31b   :  { %v1087_v19 = vmul.f32 0.01, %v999_v16  ;;  %v1118_v22 = vmax.f32 %v996_v8, %v1086_v15 }
 0x31c   :  { %v1121_v21 = vmax.f32 %v1007_v11, %v1089_v18 }
 0x31d   :  { %v1119_v23 = vmax.f32 %v999_v16, %v1087_v19  ;;  %v1501_v24 = vpop.f32.mrb[32].mxu0 }
 0x31e   :  { %v1954_v25 = vpack.c.bf16 %v1121_v21, %v1120_v20  ;;  %v1020_v26 = vadd.f32 %v1501_v24, %v1924_v13  ;;  %v1011_v27 = vpop.f32.mrb[33].mxu0 }
 0x31f   :  { %v1957_v28 = vpack.c.bf16 %v1119_v23, %v1118_v22  ;;  %v1012_v29 = vadd.f32 %v1924_v13, %v1011_v27  ;;  %v1502_v30 = vpop.f32.mrb[34].mxu0 }
 0x320   :  { %v1092_v31 = vmul.f32 0.01, %v1020_v26  ;;  %v1023_v32 = vadd.f32 %v1502_v30, %v1924_v13  ;;  %v1014_v34 = vpop.f32.mrb[35].mxu0 }
 0x321   :  { %v1090_v35 = vmul.f32 0.01, %v1012_v29  ;;  %v1015_v38 = vadd.f32 %v1924_v13, %v1014_v34 }
 0x322   :  { %v1093_v39 = vmul.f32 0.01, %v1023_v32  ;;  %v1124_v41 = vmax.f32 %v1020_v26, %v1092_v31 }
 0x323   :  { %v1091_v40 = vmul.f32 0.01, %v1015_v38  ;;  %v1122_v43 = vmax.f32 %v1012_v29, %v1090_v35 }
 0x324   :  { %v1125_v42 = vmax.f32 %v1023_v32, %v1093_v39 }
 0x325   :  { %v1123_v44 = vmax.f32 %v1015_v38, %v1091_v40  ;;  %v1505_v45 = vpop.f32.mrb[36].mxu0 }
 0x326   :  { %v1036_v46 = vadd.f32 %v1505_v45, %v1924_v13  ;;  %v1027_v47 = vpop.f32.mrb[37].mxu0  ;;  %v1148_v48 = vpack.c.bf16 %v1125_v42, %v1124_v41  ;;  %v1204_v45 = vlaneseq }
 0x327   :  { %v1028_v49 = vadd.f32 %v1924_v13, %v1027_v47  ;;  %v1506_v51 = vpop.f32.mrb[38].mxu0  ;;  %v1147_v52 = vpack.c.bf16 %v1123_v44, %v1122_v43 }
 0x328   :  { %v1096_v54 = vmul.f32 0.01, %v1036_v46  ;;  %v1039_v55 = vadd.f32 %v1506_v51, %v1924_v13  ;;  %v1030_v58 = vpop.f32.mrb[39].mxu0  ;;  %vm1218_vm0 = vcmp.lt.s32.totalorder %v1204_v45, 256 }
 0x329   :  { %v1094_v59 = vmul.f32 0.01, %v1028_v49  ;;  %v1031_v37 = vadd.f32 %v1924_v13, %v1030_v58  ;;  %1353 = vmatprep.subr.bf16.mxu1 %v1147_v52 }
 0x32a   :  { %v1097_v60 = vmul.f32 0.01, %v1039_v55  ;;  %1354 = vmatpush3.bf16.xpose.msra.mxu1 %v1933_v36  ;;  %v1128_v17 = vmax.f32 %v1036_v46, %v1096_v54 }
 0x32b   :  { %v1095_v61 = vmul.f32 0.01, %v1031_v37  ;;  %1355 = vmatprep.subr.bf16.mxu1 %v1148_v48  ;;  %v1126_v56 = vmax.f32 %v1028_v49, %v1094_v59 }
 0x32c   :  { %v1129_v50 = vmax.f32 %v1039_v55, %v1097_v60 }
 0x32d   :  { %v1127_v62 = vmax.f32 %v1031_v37, %v1095_v61  ;;  %v1509_v63 = vpop.f32.mrb[40].mxu0 }
 0x32e   :  { %v1052_v0 = vadd.f32 %v1509_v63, %v1924_v13  ;;  %v1043_v1 = vpop.f32.mrb[41].mxu0  ;;  %v1150_v2 = vpack.c.bf16 %v1129_v50, %v1128_v17 }
 0x32f   :  { %v1044_v3 = vadd.f32 %v1924_v13, %v1043_v1  ;;  %v1510_v5 = vpop.f32.mrb[42].mxu0  ;;  %v1149_v6 = vpack.c.bf16 %v1127_v62, %v1126_v56 }
 0x330   :  { %v1100_v8 = vmul.f32 0.01, %v1052_v0  ;;  %v1055_v9 = vadd.f32 %v1510_v5, %v1924_v13  ;;  %v1046_v10 = vpop.f32.mrb[43].mxu0 }
 0x331   :  { %v1098_v36 = vmul.f32 0.01, %v1044_v3  ;;  %v1047_v11 = vadd.f32 %v1924_v13, %v1046_v10 }
 0x332   :  { %v1132_v12 = vmax.f32 %v1052_v0, %v1100_v8  ;;  %v1101_v15 = vmul.f32 0.01, %v1055_v9  ;;  %1356 = vmatpush3.bf16.xpose.msra.mxu1 %v1930_v33 }
 0x333   :  { %v1130_v16 = vmax.f32 %v1044_v3, %v1098_v36  ;;  %v1099_v18 = vmul.f32 0.01, %v1047_v11  ;;  %1357 = vmatprep.subr.bf16.mxu1 %v1149_v6 }
 0x334   :  { %v1133_v19 = vmax.f32 %v1055_v9, %v1101_v15 }
 0x335   :  { %v1131_v20 = vmax.f32 %v1047_v11, %v1099_v18  ;;  %v1513_v21 = vpop.f32.mrb[44].mxu0 }
 0x336   :  { %v1068_v22 = vadd.f32 %v1513_v21, %v1924_v13  ;;  %v1059_v23 = vpop.f32.mrb[45].mxu0  ;;  %v1152_v24 = vpack.c.bf16 %v1133_v19, %v1132_v12 }
 0x337   :  { %v1060_v26 = vadd.f32 %v1924_v13, %v1059_v23  ;;  %v1514_v27 = vpop.f32.mrb[46].mxu0  ;;  %v1151_v29 = vpack.c.bf16 %v1131_v20, %v1130_v16 }
 0x338   :  { %v1104_v30 = vmul.f32 0.01, %v1068_v22  ;;  %v1071_v31 = vadd.f32 %v1514_v27, %v1924_v13  ;;  %v1062_v32 = vpop.f32.mrb[47].mxu0 }
 0x339   :  { %v1102_v34 = vmul.f32 0.01, %v1060_v26  ;;  %v1063_v33 = vadd.f32 %v1924_v13, %v1062_v32  ;;  %v1703_v13 = vmov 1966171168  }
 0x33a   :  { %1358 = vmatpush3.bf16.xpose.msra.mxu1 %v1941_v57  ;;  %v1136_v35 = vmax.f32 %v1068_v22, %v1104_v30  ;;  %v1105_v38 = vmul.f32 0.01, %v1071_v31  ;;  %v1202_v57 = vunpack.c.l.s4 %v1703_v13 }
 0x33b   :  { %1359 = vmatprep.subr.bf16.mxu1 %v1150_v2  ;;  %v1134_v39 = vmax.f32 %v1060_v26, %v1102_v34  ;;  %v1103_v40 = vmul.f32 0.01, %v1063_v33 }
 0x33c   :  { %v1137_v41 = vmax.f32 %v1071_v31, %v1105_v38  ;;  %v1203_v46 = vunpack.c.0.s8 %v1202_v57 }
 0x33d   :  { %v1135_v42 = vmax.f32 %v1063_v33, %v1103_v40 }
 0x33e   :  { %v1154_v43 = vpack.c.bf16 %v1137_v41, %v1136_v35 }
 0x33f   :  { %v1153_v44 = vpack.c.bf16 %v1135_v42, %v1134_v39 }
 0x342   :  { %1360 = vmatpush3.bf16.xpose.msra.mxu1 %v1938_v53  ;;  %v1156_v53 = vstv %s2006_s8 }
 0x343   :  { %1361 = vmatprep.subr.bf16.mxu1 %v1151_v29 }
 0x34a   :  { %1362 = vmatpush3.bf16.xpose.msra.mxu1 %v1949_v7  ;;  %v1205_v7 = vshrl.u32 %v1204_v45, 7 }
 0x34b   :  { %1363 = vmatprep.subr.bf16.mxu1 %v1152_v24 }
 0x34c   :  { %v1206_v51 = vsub.s32 %v1203_v46, %v1205_v7 }
 0x352   :  { %1364 = vmatpush3.bf16.xpose.msra.mxu1 %v1946_v4 }
 0x353   :  { %1365 = vmatprep.subr.bf16.mxu1 %v1153_v44 }
 0x35a   :  { %1366 = vmatpush3.bf16.xpose.msra.mxu1 %v1957_v28 }
 0x35b   :  { %1367 = vmatprep.subr.bf16.mxu1 %v1154_v43 }
 0x362   :  { %1368 = vmatpush3.bf16.xpose.msra.mxu1 %v1954_v25 }
 0x369   :  { %1370 = vmatmul.mubr.bf16.vlgmr.msra.gmra.mrb[48].mxu1 %v1918_v14 }
 0x43c   :  { %v1191_v47 = vpop.f32.mrb[48].mxu1 }
 0x43d   :  { %v1192_v48 = vadd.f32 %v1191_v47, %v1156_v53  ;;  %v1193_v4 = vpop.f32.mrb[49].mxu1 }
 0x43e   :  { %v1194_v49 = vadd.f32 %v1193_v4, %v1156_v53  ;;  %v1195_v28 = vpop.f32.mrb[50].mxu1 }
 0x43f   :  { %v1196_v52 = vpop.f32.mrb[51].mxu1 }
 0x440   :  { %v1200_v54 = vcombine.low %v1192_v48, %v1194_v49 }
 0x442   :  { %v1207_v14 = vrot.slane %v1200_v54, %v1206_v51 }
 0x444   :  { %v1214_v25 = vrot.slane %v1207_v14, %v1206_v51 }
 0x446   :  { %1220 = vst.msk [vmem:[#allocation11] sm:$0x3] %vm1218_vm0, %v1214_v25 }
 0x447   :  { %1678 = shalt.err (!%p1675_p8)
}
 0x448   :  { %s1679_s25 = scalar_lea.hbm %s2007_s9, 32 }
 0x449   :  { %p1680_p9 = scmp.ne.s32.totalorder %s2007_s9, %s1679_s25  ;;  %p1683_p10 = scmp.lt.u32.totalorder %s1679_s25, %s2007_s9 }
 0x44b   :  { %p1685_p11 = pnand %p1683_p10, %p1680_p9 }
 0x44d   :  { %1688 = shalt.err (!%p1685_p11)
}
 0x44e   :  { %1230 = dma.vmem_to_hbm [thread:$0]  %s1228_s20, 32, %s2007_s9, [#allocation5]  }
 0x44f   :  { %1695 = dma.done.wait [#allocation5], 32  }
 0x450   :  { %1696 = vsyncadd [#allocation5], 4294967264 }
 0x451   :  { %1234 = vsyncpa [#allocation4], 1 }
 0x452   :  { %1235 = vsyncpa [#allocation7], 1 }
 0x453   :  { %1236 = vsyncpa [#allocation10], 1 }
 0x454   :  { %1237 = vsyncpa [#allocation5], 1 }

</bundles_post_ra>
